<compile_context>
chip_gen: v5e
topology: v5e:2x2
jax: 0.10.0
libtpu: 0.0.40
codegen_flags: <defaults>
</compile_context>

<pallas_src>
import functools

import jax
import jax.numpy as jnp
from jax.experimental import pallas as pl
from jax.experimental.pallas import tpu as pltpu

_MIB = 1024 * 1024


def _normalize_kernel(x_ref, scale_ref, bias_ref, o_ref, *, block_rows, resident):
    # x_ref/o_ref: (R, Cb) VMEM tiles.
    # scale_ref/bias_ref: resident (rows_pad, 1) f32 refs sliced per step, or
    # streamed (R, 1) f32 tiles.  Either way they lane-broadcast for free.
    if resident:
        r0 = pl.program_id(0) * block_rows
        if block_rows % 8 == 0:
            r0 = pl.multiple_of(r0, 8)
        scale = scale_ref[pl.ds(r0, block_rows), :]
        bias = bias_ref[pl.ds(r0, block_rows), :]
    else:
        scale = scale_ref[...]
        bias = bias_ref[...]
    x = x_ref[...].astype(jnp.float32)
    o_ref[...] = (x * scale + bias).astype(o_ref.dtype)


def _choose_tiling(rows, cols, itemsize, target_bytes=4 * _MIB):
    """Pick (row_block, col_block): ~target_bytes per block, (8,128)-legal."""
    total_bytes = rows * cols * itemsize

    # Column tile: full width unless even an 8-row slab would blow the target.
    if cols <= 128 or min(rows, 8) * cols * itemsize <= target_bytes:
        cb = cols
    else:
        cb = (target_bytes // (min(rows, 8) * itemsize)) // 128 * 128
        cb = min(cols, max(128, cb))

    # Row tile: fill up to the target in multiples of 8 rows (or full dim).
    r = target_bytes // max(cb * itemsize, 1)
    if r >= rows:
        r = rows
    else:
        r = min(rows, max(8, (r // 8) * 8))

    # Megacore: keep at least 2 grid steps when the tensor is non-trivial so
    # v7x's two TensorCores both get work.
    if pl.cdiv(rows, r) * pl.cdiv(cols, cb) == 1 and total_bytes > 2 * _MIB:
        if rows >= 16:
            r = ((rows + 1) // 2 + 7) // 8 * 8
        elif cols >= 256:
            cb = (((cols + 1) // 2) + 127) // 128 * 128

    return r, cb


def normalize(x, mean, std):
    """(x - mean[:, None, None]) / std[:, None, None] for NCHW x."""
    N, C, H, W = x.shape

    # Per-channel constants in f32 (kept f32 regardless of x.dtype).
    mean_f32 = jnp.asarray(mean, dtype=jnp.float32).reshape(-1)
    std_f32 = jnp.asarray(std, dtype=jnp.float32).reshape(-1)
    assert mean_f32.shape == (C,) and std_f32.shape == (C,)
    inv_std = 1.0 / std_f32
    bias_c = -mean_f32 * inv_std

    rows, cols = N * C, H * W
    itemsize = jnp.dtype(x.dtype).itemsize
    x2 = x.reshape(rows, cols)

    r, cb = _choose_tiling(rows, cols, itemsize)
    grid_r, grid_c = pl.cdiv(rows, r), pl.cdiv(cols, cb)
    rows_pad = grid_r * r

    # Row index = n*C + c  ->  channel = row % C, so tiling matches row order.
    scale_rows = jnp.tile(inv_std, N)
    bias_rows = jnp.tile(bias_c, N)

    # Resident scale/bias (DMA'd once, sliced per step) as long as the
    # lane-padded VMEM cost (rows_pad * 128 lanes * 4B * 2 arrays * 2 bufs)
    # stays small; otherwise stream small (r, 1) blocks per step.
    resident = rows_pad * 2048 <= 2 * _MIB
    if resident and rows_pad > rows:
        pad = rows_pad - rows
        scale_rows = jnp.concatenate([scale_rows, jnp.zeros((pad,), jnp.float32)])
        bias_rows = jnp.concatenate([bias_rows, jnp.zeros((pad,), jnp.float32)])
    sb_rows = rows_pad if resident else rows
    sb_block_rows = rows_pad if resident else r
    scale_rows = scale_rows.reshape(sb_rows, 1)
    bias_rows = bias_rows.reshape(sb_rows, 1)

    if grid_c == 1:
        grid = (grid_r,)
        x_map = lambda i: (i, 0)
        sb_map = (lambda i: (0, 0)) if resident else (lambda i: (i, 0))
        dims = ("parallel",)
    else:
        grid = (grid_r, grid_c)
        x_map = lambda i, j: (i, j)
        sb_map = (lambda i, j: (0, 0)) if resident else (lambda i, j: (i, 0))
        dims = ("parallel", "parallel")

    # VMEM budget: double-buffered in + out data blocks plus lane-padded
    # scale/bias, with ~50% headroom; clamped to [16 MiB, 40 MiB] which is
    # safe on v5e (128 MiB phys), v6e (128 MiB phys) and v7x (64 MiB phys).
    data_block = r * cb * itemsize
    sb_bytes = 4 * ((sb_block_rows + 7) // 8 * 8) * 128 * 4
    footprint = 4 * data_block + sb_bytes
    vmem_limit = min(40 * _MIB, max(16 * _MIB, int(footprint * 1.5)))

    kernel = functools.partial(_normalize_kernel, block_rows=r, resident=resident)
    out2 = pl.pallas_call(
        kernel,
        out_shape=jax.ShapeDtypeStruct((rows, cols), x.dtype),
        grid_spec=pl.GridSpec(
            grid=grid,
            in_specs=[
                pl.BlockSpec((r, cb), x_map),
                pl.BlockSpec((sb_block_rows, 1), sb_map),
                pl.BlockSpec((sb_block_rows, 1), sb_map),
            ],
            out_specs=pl.BlockSpec((r, cb), x_map),
        ),
        compiler_params=pltpu.CompilerParams(
            dimension_semantics=dims,
            vmem_limit_bytes=vmem_limit,
        ),
    )(x2, scale_rows, bias_rows)

    return out2.reshape(N, C, H, W)


if __name__ == "__main__":
    key = jax.random.PRNGKey(0)

    # Small NCHW input: batch=2, channels=3 (RGB, CLIP normalization), 16x16.
    N, C, H, W = 2, 3, 16, 16
    x = jax.random.normal(key, (N, C, H, W), dtype=jnp.float32)

    # CLIP image normalization constants.
    mean = jnp.array([0.48145466, 0.4578275, 0.40821073], dtype=jnp.float32)
    std = jnp.array([0.26862954, 0.26130258, 0.27577711], dtype=jnp.float32)

    out = jax.block_until_ready(normalize(x, mean, std))

    # Reference check against plain JAX broadcasting semantics.
    ref = (x - mean[None, :, None, None]) / std[None, :, None, None]
    assert out.shape == ref.shape and out.dtype == ref.dtype
    # mul-by-reciprocal vs. exact divide differs by ~1 ulp -> 1e-5 tolerance.
    assert jnp.allclose(out, ref, atol=1e-5, rtol=1e-5)

    print("KERNEL_OK")
</pallas_src>

<mosaic_0001>
module attributes {stable_mosaic.version = 11 : i64} {
  func.func @_normalize_kernel(%arg0: i32, %arg1: memref<6x256xf32, #tpu.memory_space<vmem>>, %arg2: memref<6x1xf32, #tpu.memory_space<vmem>>, %arg3: memref<6x1xf32, #tpu.memory_space<vmem>>, %arg4: memref<6x256xf32, #tpu.memory_space<vmem>>) attributes {dimension_semantics = [#tpu.dimension_semantics<parallel>], iteration_bounds = array<i64: 1>, scalar_prefetch = 0 : i64, scratch_operands = 0 : i64, tpu.core_type = #tpu.core_type<tc>, window_params = [{transform_indices = @transform_0, window_bounds = array<i64: 6, 256>}, {pipeline_mode = #tpu.pipeline_mode<synchronous>, transform_indices = @transform_1, window_bounds = array<i64: 6, 1>}, {pipeline_mode = #tpu.pipeline_mode<synchronous>, transform_indices = @transform_2, window_bounds = array<i64: 6, 1>}, {transform_indices = @transform_3, window_bounds = array<i64: 6, 256>}]} {
    %c6_i32 = arith.constant 6 : i32
    %0 = arith.muli %arg0, %c6_i32 : i32
    %1 = arith.index_cast %0 : i32 to index
    %c0 = arith.constant 0 : index
    %2 = vector.load %arg2[%1, %c0] : memref<6x1xf32, #tpu.memory_space<vmem>>, vector<6x1xf32>
    %3 = arith.index_cast %0 : i32 to index
    %c0_0 = arith.constant 0 : index
    %4 = vector.load %arg3[%3, %c0_0] : memref<6x1xf32, #tpu.memory_space<vmem>>, vector<6x1xf32>
    %c0_1 = arith.constant 0 : index
    %c0_2 = arith.constant 0 : index
    %5 = vector.load %arg1[%c0_1, %c0_2] : memref<6x256xf32, #tpu.memory_space<vmem>>, vector<6x256xf32>
    %6 = vector.broadcast %2 : vector<6x1xf32> to vector<6x256xf32>
    %7 = arith.mulf %5, %6 : vector<6x256xf32>
    %8 = vector.broadcast %4 : vector<6x1xf32> to vector<6x256xf32>
    %9 = arith.addf %7, %8 : vector<6x256xf32>
    %c0_3 = arith.constant 0 : index
    %c0_4 = arith.constant 0 : index
    %10 = vector.load %arg4[%c0_3, %c0_4] : memref<6x256xf32, #tpu.memory_space<vmem>>, vector<6x256xf32>
    tpu.vector_store %arg4[%c0_3, %c0_4], %9 {strides = array<i32>} : memref<6x256xf32, #tpu.memory_space<vmem>>, vector<6x256xf32>,
    return
  }
  func.func @transform_0(%arg0: i32) -> (i32, i32) {
    %c0_i32 = arith.constant 0 : i32
    %c0_i32_0 = arith.constant 0 : i32
    return %arg0, %c0_i32 : i32, i32
  }
  func.func @transform_1(%arg0: i32) -> (i32, i32) {
    %c0_i32 = arith.constant 0 : i32
    %c0_i32_0 = arith.constant 0 : i32
    %c0_i32_1 = arith.constant 0 : i32
    return %c0_i32, %c0_i32_0 : i32, i32
  }
  func.func @transform_2(%arg0: i32) -> (i32, i32) {
    %c0_i32 = arith.constant 0 : i32
    %c0_i32_0 = arith.constant 0 : i32
    %c0_i32_1 = arith.constant 0 : i32
    return %c0_i32, %c0_i32_0 : i32, i32
  }
  func.func @transform_3(%arg0: i32) -> (i32, i32) {
    %c0_i32 = arith.constant 0 : i32
    %c0_i32_0 = arith.constant 0 : i32
    return %arg0, %c0_i32 : i32, i32
  }
}

</mosaic_0001>

<bundles_post_ra>
// kernel: tpu_custom_call.1
= control target key start
LH: loop header
LB: loop body
LE: loop exit
PB: predicated region body
PF: predicated region fallthrough
CT: control target
= control target key end

     0   :  { %v83_v1 = vmov 0   ;;  %s120_s0 = inlined_call_operand.vmem [shape: f32[6,256], index: 0, kind: input, shape index: {}]   ;;  %s121_s1 = inlined_call_operand.vmem [shape: f32[6,1], index: 1, kind: input, shape index: {}]   ;;  %s122_s2 = inlined_call_operand.vmem [shape: f32[6,1], index: 2, kind: input, shape index: {}]   ;;  %s123_s3 = inlined_call_operand.hbm [shape: f32[6,256], index: 3, kind: output, shape index: {}]  }
   0x1   :  { %v17_v0 = vld [vmem:[%s121_s1] sm:$0x3f]  ;;  %56 = vset.pattern.permute.xlu0 %v83_v1 }
   0x2   :  { %8 = vsyncpa [#allocation3], 0  ;;  %24 = vperm.xlu0 %56, %v17_v0   ;;  %v19_v2 = vld [vmem:[%s122_s2] sm:$0x3f]  ;;  %v21_v5 = vld [vmem:[%s120_s0 + $0x8] sm:$0x3f] }
   0x3   :  { %v20_v4 = vld [vmem:[%s120_s0] sm:$0x3f]  ;;  %s84_s1 = smov [#allocation2]   ;;  %s45_s23 = sshll.u32 %s123_s3, 4  ;;  %s46_s23 = int_to_ptr.hbm [resolvable:$true] %s45_s23 }
   0x4   :  { %s43_s20 = sshll.u32 %s84_s1, 4  ;;  %s44_s20 = int_to_ptr.vmem [resolvable:$true] %s43_s20 }
   0xa   :  { %31 = vperm.xlu0 %56, %v19_v2  }
  0x74   :  { %v25_v3 = vpop.permute.xlu0 %24 }
  0x75   :  { %v27_v6 = vmul.f32 %v25_v3, %v20_v4  ;;  %v28_v7 = vmul.f32 %v25_v3, %v21_v5 }
  0x7c   :  { %v32_v8 = vpop.permute.xlu0 %31 }
  0x7d   :  { %v34_v9 = vadd.f32 %v32_v8, %v27_v6  ;;  %v35_v10 = vadd.f32 %v32_v8, %v28_v7 }
  0x7f   :  { %36 = vst [vmem:[#allocation2] sm:$0x3f] %v34_v9 }
  0x80   :  { %37 = vst [vmem:[#allocation2 + $0x8] sm:$0x3f] %v35_v10 }
  0x81   :  { %48 = dma.vmem_to_hbm [thread:$0]  %s44_s20, 256, %s46_s23, [#allocation3]  }
  0x82   :  { %81 = dma.done.wait [#allocation3], 256  }
  0x83   :  { %82 = vsyncadd [#allocation3], 4294967040 }
  0x84   :  { %53 = vsyncpa [#allocation3], 1 }

</bundles_post_ra>
